<compile_context>
chip_gen: v6e
topology: v6e:2x2x1
jax: 0.10.0
libtpu: 0.0.40
codegen_flags: <defaults>
</compile_context>

<pallas_src>
import functools

import jax
import jax.numpy as jnp
from jax.experimental import pallas as pl
from jax.experimental.pallas import tpu as pltpu

_NUM_CORES = 2      # leading "parallel" grid axis (both v7x TensorCores)
_LANES = 128
_NLL_BLOCK_BYTES = 2 * 1024 * 1024   # target p-block size per buffer


def _round_up(x: int, m: int) -> int:
    return ((x + m - 1) // m) * m


def _round_down(x: int, m: int) -> int:
    return (x // m) * m


# ---------------------------------------------------------------------------
# Kernels
# ---------------------------------------------------------------------------
def _nll_kernel(p_ref, y_ref, out_ref, acc_ref, *, n_valid: int, blocks_per_core: int):
    """sum_i log(p[i, y_i] + 1e-10), accumulated per core into a (tile_n, 1) VMEM acc."""
    t = pl.program_id(1)

    @pl.when(t == 0)
    def _():
        acc_ref[...] = jnp.zeros_like(acc_ref)

    p = p_ref[...].astype(jnp.float32)          # (tile_n, C)
    y = y_ref[...]                              # (tile_n, 1) int32
    tn, c = p.shape

    # One-hot select on the VPU, then a single column of logs on the EUP.
    col = jax.lax.broadcasted_iota(jnp.int32, (tn, c), 1)
    picked = jnp.sum(jnp.where(col == y, p, 0.0), axis=-1, keepdims=True)   # (tile_n, 1)
    logp = jnp.log(picked + 1e-10)

    # Ragged last block (and the clamped duplicate block on the second core when the
    # block count is odd) is masked via the *logical* row index -- no wrapper pad.
    block = pl.program_id(0) * blocks_per_core + t
    row = block * tn + jax.lax.broadcasted_iota(jnp.int32, (tn, 1), 0)
    acc_ref[...] += jnp.where(row < n_valid, logp, 0.0)     # select: garbage/NaN safe

    @pl.when(t == pl.num_programs(1) - 1)
    def _():
        out_ref[0] = acc_ref[...]


def _bce_kernel(p_ref, y_ref, out_ref, acc_ref):
    """sum_i [y*log(p1) + (1-y)*log(1-p1)] (clamped at -100), lane-dense, no mask."""
    t = pl.program_id(1)

    @pl.when(t == 0)
    def _():
        acc_ref[...] = jnp.zeros_like(acc_ref)

    p = p_ref[...].astype(jnp.float32)          # (tile_r, 128)
    y = y_ref[...]                              # (tile_r, 128) bf16 in {0, 1}

    # Hard {0,1} targets -> select-before-log: one log, one clamp per element.
    # Zero padding is loss-neutral: p=0, y=0 -> log(1 - 0) = 0.
    p_sel = jnp.where(y != 0, p, 1.0 - p)
    ll = jnp.maximum(jnp.log(p_sel), -100.0)    # torch BCELoss log clamp

    acc_ref[...] += jnp.sum(ll, axis=0, keepdims=True)      # (1, 128) lane partials

    @pl.when(t == pl.num_programs(1) - 1)
    def _():
        out_ref[0] = acc_ref[...]


# ---------------------------------------------------------------------------
# Branch implementations (jitted; tile hints are static)
# ---------------------------------------------------------------------------
@functools.partial(jax.jit, static_argnames=("tile_hint",))
def _nll_loss(p_bar, y, tile_hint=None):
    n, c = p_bar.shape
    itemsize = jnp.dtype(p_bar.dtype).itemsize

    # C-aware tile: ~2 MiB p-block per buffer, sublane multiple of 16 (bf16-safe).
    if tile_hint is None:
        tile_n = max(16, _round_down(_NLL_BLOCK_BYTES // (c * itemsize), 16))
    else:
        tile_n = max(16, _round_up(int(tile_hint), 16))
    if tile_n >= n:
        tile_n = n                              # single block == full array dims

    num_blocks = pl.cdiv(n, tile_n)
    bpc = pl.cdiv(num_blocks, _NUM_CORES)       # blocks handled per parallel index
    last = num_blocks - 1

    y2 = y.astype(jnp.int32).reshape(n, 1)

    def blk_map(par, t):
        # Clamp so the DMA never walks past the array; duplicated / ragged blocks are
        # zeroed by the in-kernel logical-row mask.
        return (jnp.minimum(par * bpc + t, last), 0)

    out = pl.pallas_call(
        functools.partial(_nll_kernel, n_valid=n, blocks_per_core=bpc),
        out_shape=jax.ShapeDtypeStruct((_NUM_CORES, tile_n, 1), jnp.float32),
        grid=(_NUM_CORES, bpc),
        in_specs=[
            pl.BlockSpec((tile_n, c), blk_map),
            pl.BlockSpec((tile_n, 1), blk_map),
        ],
        out_specs=pl.BlockSpec((1, tile_n, 1), lambda par, t: (par, 0, 0)),
        scratch_shapes=[pltpu.VMEM((tile_n, 1), jnp.float32)],
        compiler_params=pltpu.CompilerParams(
            dimension_semantics=("parallel", "arbitrary"),
            vmem_limit_bytes=32 * 1024 * 1024),
    )(p_bar, y2)

    return -jnp.sum(out) / jnp.float32(n)


@functools.partial(jax.jit, static_argnames=("tile_hint",))
def _bce_loss(p_bar, y, tile_hint=None):
    n = p_bar.shape[0]
    rows_needed = pl.cdiv(n, _LANES)

    tile_r = 4096 if tile_hint is None else int(tile_hint)
    tile_r = max(16, _round_up(tile_r, 16))
    if tile_r > rows_needed:
        tile_r = _round_up(rows_needed, 16)

    padded_rows = _round_up(rows_needed, _NUM_CORES * tile_r)
    padded = padded_rows * _LANES
    tpc = padded_rows // (_NUM_CORES * tile_r)  # tiles per parallel index

    # Slice column 1, zero-pad and reshape lane-dense; fuses into one XLA pass under
    # jit.  y goes as bf16 (exact for {0,1} labels) to halve its HBM traffic.
    p1 = jnp.pad(p_bar[:, 1], (0, padded - n)).reshape(padded_rows, _LANES)
    yb = jnp.pad(y.astype(jnp.bfloat16), (0, padded - n)).reshape(padded_rows, _LANES)

    out = pl.pallas_call(
        _bce_kernel,
        out_shape=jax.ShapeDtypeStruct((_NUM_CORES, 1, _LANES), jnp.float32),
        grid=(_NUM_CORES, tpc),
        in_specs=[
            pl.BlockSpec((tile_r, _LANES), lambda par, t: (par * tpc + t, 0)),
            pl.BlockSpec((tile_r, _LANES), lambda par, t: (par * tpc + t, 0)),
        ],
        out_specs=pl.BlockSpec((1, 1, _LANES), lambda par, t: (par, 0, 0)),
        scratch_shapes=[pltpu.VMEM((1, _LANES), jnp.float32)],
        compiler_params=pltpu.CompilerParams(
            dimension_semantics=("parallel", "arbitrary")),
    )(p1, yb)

    return -jnp.sum(out) / jnp.float32(n)


# ---------------------------------------------------------------------------
# Module wrapper (mirrors CalibrationLoss)
# ---------------------------------------------------------------------------
class CalibrationLoss:
    def __init__(self, tile_n=None, tile_r=None):
        self.tile_n = tile_n   # optional NLL batch-tile override (rounded to 16)
        self.tile_r = tile_r   # optional BCE lane-row tile override (rounded to 16)

    def forward(self, p_preds, weights_l, y):
        # The reference nn.Module forward body is `pass`.
        return None

    def compute_reg_loss(self, p_bar: jnp.ndarray, y: jnp.ndarray) -> jnp.ndarray:
        if p_bar.shape[1] > 2:
            return _nll_loss(p_bar, y, tile_hint=self.tile_n)
        return _bce_loss(p_bar, y, tile_hint=self.tile_r)


# ---------------------------------------------------------------------------
# Pure-JAX reference for sanity checks
# ---------------------------------------------------------------------------
def _ref_reg_loss(p_bar, y):
    n, c = p_bar.shape
    p_bar = p_bar.astype(jnp.float32)
    if c > 2:
        logp = jnp.log(p_bar + 1e-10)
        return -jnp.mean(logp[jnp.arange(n), y.astype(jnp.int32)])
    p1 = p_bar[:, 1]
    yf = y.astype(jnp.float32)
    lp = jnp.maximum(jnp.log(p1), -100.0)
    l1p = jnp.maximum(jnp.log(1.0 - p1), -100.0)
    return -jnp.mean(yf * lp + (1.0 - yf) * l1p)


if __name__ == "__main__":
    key = jax.random.PRNGKey(0)
    ks = jax.random.split(key, 10)

    loss_mod = CalibrationLoss()                            # auto tiles
    loss_small = CalibrationLoss(tile_n=16, tile_r=16)      # force multi-block grids

    # --- NLL, small batch, single block (tile_n == N, ragged dims) ---
    N, C = 10, 32
    p_multi = jax.nn.softmax(jax.random.normal(ks[0], (N, C), jnp.float32), -1)
    y_multi = jax.random.randint(ks[1], (N,), 0, C)
    got = jax.block_until_ready(loss_mod.compute_reg_loss(p_multi, y_multi))
    want = _ref_reg_loss(p_multi, y_multi)
    assert jnp.allclose(got, want, atol=1e-5, rtol=1e-5), (got, want)

    # --- NLL, multi-block: 7 blocks over 2 "cores" (ragged last block + clamp) ---
    N2, C2 = 100, 16
    p2 = jax.nn.softmax(jax.random.normal(ks[2], (N2, C2), jnp.float32), -1)
    y2 = jax.random.randint(ks[3], (N2,), 0, C2)
    got2 = jax.block_until_ready(loss_small.compute_reg_loss(p2, y2))
    want2 = _ref_reg_loss(p2, y2)
    assert jnp.allclose(got2, want2, atol=1e-5, rtol=1e-5), (got2, want2)

    # --- NLL, bf16 ingestion (no wrapper f32 cast), ragged bf16 last block ---
    N3, C3 = 24, 16
    p3 = jax.nn.softmax(jax.random.normal(ks[4], (N3, C3), jnp.float32), -1)
    p3_bf16 = p3.astype(jnp.bfloat16)
    y3 = jax.random.randint(ks[5], (N3,), 0, C3)
    got3 = jax.block_until_ready(loss_small.compute_reg_loss(p3_bf16, y3))
    want3 = _ref_reg_loss(p3_bf16.astype(jnp.float32), y3)
    assert jnp.allclose(got3, want3, atol=1e-4, rtol=1e-4), (got3, want3)

    # --- BCE, small batch, single lane-dense tile per core ---
    p_bin = jax.nn.softmax(jax.random.normal(ks[6], (N, 2), jnp.float32), -1)
    y_bin = jax.random.randint(ks[7], (N,), 0, 2)
    got4 = jax.block_until_ready(loss_mod.compute_reg_loss(p_bin, y_bin))
    want4 = _ref_reg_loss(p_bin, y_bin)
    assert jnp.allclose(got4, want4, atol=1e-5, rtol=1e-5), (got4, want4)

    # --- BCE, multi-block (grid (2, 2)), zero-padded tail, bf16 labels ---
    N4 = 5000
    p_bin4 = jax.nn.softmax(jax.random.normal(ks[8], (N4, 2), jnp.float32), -1)
    y_bin4 = jax.random.randint(ks[9], (N4,), 0, 2)
    got5 = jax.block_until_ready(loss_small.compute_reg_loss(p_bin4, y_bin4))
    want5 = _ref_reg_loss(p_bin4, y_bin4)
    assert jnp.allclose(got5, want5, atol=1e-4, rtol=1e-4), (got5, want5)

    print("KERNEL_OK")
</pallas_src>

<mosaic_0001>
module attributes {stable_mosaic.version = 11 : i64} {
  func.func @_nll_kernel(%arg0: i32, %arg1: i32, %arg2: memref<10x32xf32, #tpu.memory_space<vmem>>, %arg3: memref<10x1xi32, #tpu.memory_space<vmem>>, %arg4: memref<1x10x1xf32, #tpu.memory_space<vmem>>, %arg5: memref<10x1xf32, #tpu.memory_space<vmem>>) attributes {dimension_semantics = [#tpu.dimension_semantics<parallel>, #tpu.dimension_semantics<arbitrary>], iteration_bounds = array<i64: 2, 1>, scalar_prefetch = 0 : i64, scratch_operands = 1 : i64, tpu.core_type = #tpu.core_type<tc>, window_params = [{transform_indices = @transform_0, window_bounds = array<i64: 10, 32>}, {transform_indices = @transform_1, window_bounds = array<i64: 10, 1>}, {transform_indices = @transform_2, window_bounds = array<i64: 1, 10, 1>}]} {
    %c0_i32 = arith.constant 0 : i32
    %0 = arith.cmpi eq, %arg1, %c0_i32 : i32
    %1 = arith.extui %0 : i1 to i32
    %c0_i32_0 = arith.constant 0 : i32
    %2 = arith.cmpi ne, %1, %c0_i32_0 : i32
    scf.if %2 {
      %cst_14 = arith.constant 0.000000e+00 : f32
      %31 = vector.broadcast %cst_14 : f32 to vector<10x1xf32>
      %c0_15 = arith.constant 0 : index
      %c0_16 = arith.constant 0 : index
      %32 = vector.load %arg5[%c0_15, %c0_16] : memref<10x1xf32, #tpu.memory_space<vmem>>, vector<10x1xf32>
      tpu.vector_store %arg5[%c0_15, %c0_16], %31 {strides = array<i32>} : memref<10x1xf32, #tpu.memory_space<vmem>>, vector<10x1xf32>,
    } else {
    }
    %c0 = arith.constant 0 : index
    %c0_1 = arith.constant 0 : index
    %3 = vector.load %arg2[%c0, %c0_1] : memref<10x32xf32, #tpu.memory_space<vmem>>, vector<10x32xf32>
    %c0_2 = arith.constant 0 : index
    %c0_3 = arith.constant 0 : index
    %4 = vector.load %arg3[%c0_2, %c0_3] : memref<10x1xi32, #tpu.memory_space<vmem>>, vector<10x1xi32>
    %5 = tpu.iota {dimensions = array<i32: 1>} : vector<10x32xi32>
    %6 = vector.broadcast %4 : vector<10x1xi32> to vector<10x32xi32>
    %7 = arith.cmpi eq, %5, %6 : vector<10x32xi32>
    %cst = arith.constant 0.000000e+00 : f32
    %8 = vector.broadcast %cst : f32 to vector<10x32xf32>
    %9 = arith.select %7, %3, %8 : vector<10x32xi1>, vector<10x32xf32>
    %cst_4 = arith.constant dense<0.000000e+00> : vector<10xf32>
    %10 = vector.multi_reduction <add>, %9, %cst_4 [1] : vector<10x32xf32> to vector<10xf32>
    %11 = vector.shape_cast %10 : vector<10xf32> to vector<10x1xf32>
    %cst_5 = arith.constant 1.000000e-10 : f32
    %12 = vector.broadcast %cst_5 : f32 to vector<10x1xf32>
    %13 = arith.addf %11, %12 : vector<10x1xf32>
    %14 = math.log %13 : vector<10x1xf32>
    %c1_i32 = arith.constant 1 : i32
    %15 = arith.muli %arg0, %c1_i32 : i32
    %16 = arith.addi %15, %arg1 : i32
    %c10_i32 = arith.constant 10 : i32
    %17 = arith.muli %16, %c10_i32 : i32
    %18 = tpu.iota {dimensions = array<i32: 0>} : vector<10x1xi32>
    %19 = vector.broadcast %17 : i32 to vector<10x1xi32>
    %20 = arith.addi %19, %18 : vector<10x1xi32>
    %c0_6 = arith.constant 0 : index
    %c0_7 = arith.constant 0 : index
    %21 = vector.load %arg5[%c0_6, %c0_7] : memref<10x1xf32, #tpu.memory_space<vmem>>, vector<10x1xf32>
    %c10_i32_8 = arith.constant 10 : i32
    %22 = vector.broadcast %c10_i32_8 : i32 to vector<10x1xi32>
    %23 = arith.cmpi slt, %20, %22 : vector<10x1xi32>
    %cst_9 = arith.constant 0.000000e+00 : f32
    %24 = vector.broadcast %cst_9 : f32 to vector<10x1xf32>
    %25 = arith.select %23, %14, %24 : vector<10x1xi1>, vector<10x1xf32>
    %26 = arith.addf %21, %25 : vector<10x1xf32>
    %c0_10 = arith.constant 0 : index
    %c0_11 = arith.constant 0 : index
    %27 = vector.load %arg5[%c0_10, %c0_11] : memref<10x1xf32, #tpu.memory_space<vmem>>, vector<10x1xf32>
    tpu.vector_store %arg5[%c0_10, %c0_11], %26 {strides = array<i32>} : memref<10x1xf32, #tpu.memory_space<vmem>>, vector<10x1xf32>,
    %c0_i32_12 = arith.constant 0 : i32
    %28 = arith.cmpi eq, %arg1, %c0_i32_12 : i32
    %29 = arith.extui %28 : i1 to i32
    %c0_i32_13 = arith.constant 0 : i32
    %30 = arith.cmpi ne, %29, %c0_i32_13 : i32
    scf.if %30 {
      %c0_14 = arith.constant 0 : index
      %c0_15 = arith.constant 0 : index
      %31 = vector.load %arg5[%c0_14, %c0_15] : memref<10x1xf32, #tpu.memory_space<vmem>>, vector<10x1xf32>
      %c0_16 = arith.constant 0 : index
      %c0_17 = arith.constant 0 : index
      %c0_18 = arith.constant 0 : index
      %32 = vector.load %arg4[%c0_16, %c0_17, %c0_18] : memref<1x10x1xf32, #tpu.memory_space<vmem>>, vector<1x10x1xf32>
      %33 = vector.shape_cast %32 : vector<1x10x1xf32> to vector<10x1xf32>
      %34 = vector.shape_cast %31 : vector<10x1xf32> to vector<1x10x1xf32>
      tpu.vector_store %arg4[%c0_16, %c0_17, %c0_18], %34 {strides = array<i32>} : memref<1x10x1xf32, #tpu.memory_space<vmem>>, vector<1x10x1xf32>,
    } else {
    }
    return
  }
  func.func @transform_0(%arg0: i32, %arg1: i32) -> (i32, i32) {
    %c1_i32 = arith.constant 1 : i32
    %0 = arith.muli %arg0, %c1_i32 : i32
    %1 = arith.addi %0, %arg1 : i32
    %c0_i32 = arith.constant 0 : i32
    %2 = arith.minsi %1, %c0_i32 : i32
    %c0_i32_0 = arith.constant 0 : i32
    %c0_i32_1 = arith.constant 0 : i32
    return %2, %c0_i32_0 : i32, i32
  }
  func.func @transform_1(%arg0: i32, %arg1: i32) -> (i32, i32) {
    %c1_i32 = arith.constant 1 : i32
    %0 = arith.muli %arg0, %c1_i32 : i32
    %1 = arith.addi %0, %arg1 : i32
    %c0_i32 = arith.constant 0 : i32
    %2 = arith.minsi %1, %c0_i32 : i32
    %c0_i32_0 = arith.constant 0 : i32
    %c0_i32_1 = arith.constant 0 : i32
    return %2, %c0_i32_0 : i32, i32
  }
  func.func @transform_2(%arg0: i32, %arg1: i32) -> (i32, i32, i32) {
    %c0_i32 = arith.constant 0 : i32
    %c0_i32_0 = arith.constant 0 : i32
    %c0_i32_1 = arith.constant 0 : i32
    return %arg0, %c0_i32, %c0_i32_0 : i32, i32, i32
  }
}

</mosaic_0001>

<bundles_post_ra>
// kernel: _nll_loss.1
= control target key start
LH: loop header
LB: loop body
LE: loop exit
PB: predicated region body
PF: predicated region fallthrough
CT: control target
= control target key end

     0   :  { %s448_s9 = smov 0   ;;  %s450_s10 = smov 0   ;;  %s497_s0 = inlined_call_operand.vmem [shape: f32[10,32], index: 0, kind: input, shape index: {}]   ;;  %s498_s1 = inlined_call_operand.vmem [shape: s32[10,1], index: 1, kind: input, shape index: {}]   ;;  %s499_s2 = inlined_call_operand.vmem [shape: f32[2,10,1], index: 2, kind: output, shape index: {}]  }
   0x1   :  { %s452_s11 = smov 0  }
   0x2 LB: > { %s24_s12 = sadd.s32 1, %s425_s10  ;;  %p366_p0 = scmp.ge.s32.totalorder %s429_s11, 1  ;;  %s429_s11 = sphi %s452_s11, %s12_s11   ;;  %s425_s10 = sphi %s450_s10, %s501_s10   ;;  %s421_s9 = sphi %s448_s9, %s500_s9  }
   0x3   : > { %p26_p1 = scmp.ge.s32.totalorder %s24_s12, 2  ;;  %p160_p2 = scmp.lt.s32.totalorder %s429_s11, 3 }
   0x5   : > { %s503_s12 = smov (%p26_p1, %s24_s12), 0  ;;  %p161_p3 = pnand %p366_p0, %p160_p2 }
   0x6   : > { %p194_p4 = scmp.lt.s32.totalorder (!%p161_p3), %s421_s9, 0  ;;  %s261_s22 = smul.u32 (!%p161_p3), 10, %s421_s9 }
   0x7   : > { %164 = sbr.rel (%p161_p3) target bundleno = 320 (0x140), region = 28  ;;  %p217_p6 = scmp.lt.s32.totalorder (!%p161_p3), %s421_s9, 1 }
   0xc   : > { %v431_v0 = vmov 0   ;;  %s195_s13 = scalar_select %p194_p4, %s421_s9, 0  ;;  %vm226_vm0 = vcmask 7168   ;;  %v432_v3 = vmov 0.0   ;;  %v234_v4 = vlaneseq }
   0xd   : > { %402 = vset.pattern.permute.xlu0 %v431_v0  ;;  %227 = vst.msk [vmem:[#allocation2] sm:$0xff] %vm226_vm0, %v432_v3  ;;  %vm246_vm1 = vcmask 261120   ;;  %vm250_vm3 = vcmask 254976   ;;  %vm228_vm5 = vcmask 1024   ;;  %v265_v19 = vstv %s261_s22  ;;  %s507_s9 = smov (!%p217_p6, %s421_s9), 1 }
   0xe   : > { %s367_s14 = sshll.u32 %s195_s13, 1  ;;  %v235_v5 = vand.u32 127, %v234_v4  ;;  %229 = vst.msk [vmem:[#allocation2 + $0x8] sm:$0x3] %vm228_vm5, %v432_v3  ;;  %v263_v18 = vshrl.u32 %v234_v4, 7  ;;  %s375_s23 = sshll.u32 %s507_s9, 4 }
   0xf   : > { %p197_p5 = scmp.lt.s32.totalorder %s367_s14, 1  ;;  %s221_s26 = scalar_lea.vmem %s499_s2, %s375_s23 }
  0x10   : > { %v264_v20 = vadd.s32 8, %v263_v18  ;;  %v266_v21 = vadd.s32 %v265_v19, %v263_v18 }
  0x11   : > { %s505_s14 = smov (!%p197_p5, %s367_s14), 1 }
  0x12   : > { %s368_s15 = sshll.u32 %s505_s14, 3  ;;  %vm270_vm6 = vcmp.lt.s32.totalorder %v266_v21, 10  ;;  %v267_v23 = vadd.s32 %v265_v19, %v264_v20 }
  0x13   : > { %s212_s18 = scalar_lea.vmem %s498_s1, %s368_s15  ;;  %s200_s21 = scalar_lea.vmem %s497_s0, %s368_s15 }
  0x14   : > { %v232_v1 = vld [vmem:[%s212_s18] sm:$0xff]  ;;  %v233_v2 = vld [vmem:[%s212_s18 + $0x8] sm:$0x3]  ;;  %vm271_vm7 = vcmp.lt.s32.totalorder %v267_v23, 10 }
  0x15   : > { %237 = vperm.xlu0 %402, %v232_v1   ;;  %v230_v6 = vld [vmem:[%s200_s21] sm:$0xff]  ;;  %v231_v10 = vld [vmem:[%s200_s21 + $0x8] sm:$0x3] }
  0x16   : > { %v268_v24 = vld [vmem:[#allocation2] sm:$0xff]  ;;  %v269_v29 = vld [vmem:[#allocation2 + $0x8] sm:$0x3] }
  0x19   : > { %240 = vperm.xlu0 %402, %v233_v2  }
  0x90   : > { %v238_v7 = vpop.permute.xlu0 %237 }
  0x91   : > { %vm242_vm2 = vcmp.eq.s32.totalorder %v235_v5, %v238_v7 }
  0x92   : > { %v244_v8 = vsel %vm242_vm2, %v230_v6, 0.0 }
  0x93   : > { %v247_v9 = vsel %vm246_vm1, %v244_v8, 0.0 }
  0x94   : > { %v241_v11 = vpop.permute.xlu0 %240  ;;  %248 = vadd.xlane.f32.xlu1 %v247_v9 }
  0x95   : > { %vm243_vm4 = vcmp.eq.s32.totalorder %v235_v5, %v241_v11 }
  0x96   : > { %v245_v12 = vsel %vm243_vm4, %v231_v10, 0.0 }
  0x97   : > { %v251_v13 = vsel %vm250_vm3, %v245_v12, 0.0 }
  0x98   : > { %252 = vadd.xlane.f32.xlu1 %v251_v13 }
 0x11d   : > { %v249_v14 = vpop.xlane.xlu1 %248 }
 0x11e   : > { %v254_v15 = vadd.f32 1e-10, %v249_v14 }
 0x120   : > { %403 = vlog2.f32 %v254_v15 }
 0x121   : > { %v253_v16 = vpop.xlane.xlu1 %252 }
 0x122   : > { %v255_v17 = vadd.f32 1e-10, %v253_v16 }
 0x124   : > { %405 = vlog2.f32 %v255_v17 }
 0x12d   : > { %v404_v22 = vpop.eup %403 }
 0x12e   : > { %v257_v25 = vmul.f32 0.6931472, %v404_v22 }
 0x130   : > { %v272_v26 = vsel %vm270_vm6, %v257_v25, 0.0 }
 0x131   : > { %v406_v27 = vpop.eup %405  ;;  %v274_v28 = vadd.f32 %v272_v26, %v268_v24 }
 0x132   : > { %v259_v30 = vmul.f32 0.6931472, %v406_v27 }
 0x133   : > { %277 = vst.msk [vmem:[#allocation2] sm:$0xff] %vm226_vm0, %v274_v28 }
 0x134   : > { %v273_v31 = vsel %vm271_vm7, %v259_v30, 0.0 }
 0x135   : > { %v275_v32 = vadd.f32 %v273_v31, %v269_v29 }
 0x137   : > { %279 = vst.msk [vmem:[#allocation2 + $0x8] sm:$0x3] %vm228_vm5, %v275_v32 }
 0x13a   : > { %v283_v33 = vld [vmem:[#allocation2] sm:$0xff] }
 0x13b   : > { %285 = vst.msk [vmem:[%s221_s26] sm:$0xff] %vm226_vm0, %v283_v33 }
 0x13e   : > { %v284_v34 = vld [vmem:[#allocation2 + $0x8] sm:$0x3] }
 0x13f   : > { %286 = vst.msk [vmem:[%s221_s26 + $0x8] sm:$0x3] %vm228_vm5, %v284_v34 }
 0x140 PF: > { %s12_s11 = sadd.s32 1, %s429_s11   ;;  %s500_s9 = smov %s425_s10 }
 0x141   : > { %p9_p7 = scmp.ge.s32.totalorder %s12_s11, 4   ;;  %s501_s10 = smov %s503_s12 }
 0x143   :  { %11 = sbr.rel (!%p9_p7) target bundleno = 2 (0x2), region = 69 }

</bundles_post_ra>
